<compile_context>
chip_gen: v5e
topology: v5e:2x2
jax: 0.10.0
libtpu: 0.0.40
codegen_flags: <defaults>
</compile_context>

<pallas_src>
import math

import jax
import jax.numpy as jnp
from jax import lax
from jax.experimental import pallas as pl
from jax.experimental.pallas import tpu as pltpu

_LANE = 128                      # lane width of a TPU vreg
_TARGET_BLOCK_BYTES = 2 * 1024 * 1024   # ~2 MiB per input per buffer -> roofline plateau
_DEFAULT_NUM_CHUNKS = 2          # leading "parallel" axis; lets v7x use both TensorCores


def _make_l1_kernel(tile_r: int, tiles_per_chunk: int):
    """Builds the tiled |p - t| partial-sum kernel for a (tile_r, 128) block."""

    def kernel(meta_ref, p_ref, t_ref, out_ref):
        # meta_ref: SMEM int32 (1,)  -> number of valid rows
        # p_ref/t_ref: (tile_r, 128) VMEM blocks, native dtype
        # out_ref: (8, 128) f32 partial-sum block, resident across the whole t-axis
        c = pl.program_id(0)          # parallel chunk (megacore axis on v7x)
        t = pl.program_id(1)          # sequential tile within the chunk (reduction axis)

        @pl.when(t == 0)
        def _init():
            out_ref[...] = jnp.zeros_like(out_ref)

        valid_rows = meta_ref[0]
        tile_idx = c * tiles_per_chunk + t            # un-clamped logical tile index
        row0 = tile_idx * tile_r
        rid = lax.broadcasted_iota(jnp.int32, (tile_r, _LANE), 0) + row0

        diff = p_ref[...].astype(jnp.float32) - t_ref[...].astype(jnp.float32)
        # Mask rows past the end of the data (ragged last tile / clamped duplicate tiles).
        absdiff = jnp.where(rid < valid_rows, jnp.abs(diff), 0.0)

        if tile_r % 8 == 0:
            # Pure-VPU partial reduce: fold groups of 8 rows (one vreg each) into (8, 128).
            partial = jnp.sum(absdiff.reshape(tile_r // 8, 8, _LANE), axis=0)
        else:
            # Rare tiny single-tile case (rows < 8 or odd row count): sublane-reduce, then
            # place the (1,128) result in row 0 of the (8,128) accumulator.
            colsum = jnp.sum(absdiff, axis=0, keepdims=True)
            row_sel = lax.broadcasted_iota(jnp.int32, (8, _LANE), 0) == 0
            partial = jnp.where(row_sel, colsum, 0.0)

        out_ref[...] += partial

    return kernel


def l1_loss(preds: jax.Array, targets: jax.Array, *,
            tile_rows: int | None = None,
            num_chunks: int = _DEFAULT_NUM_CHUNKS) -> jax.Array:
    """Mean absolute error over all elements, matching nn.L1Loss() defaults.

    preds, targets: arrays of identical shape (any rank, any float dtype)
    returns:        scalar float32 loss
    """
    assert preds.shape == targets.shape, (preds.shape, targets.shape)
    total = math.prod(preds.shape)
    assert total > 0, "L1Loss over an empty tensor is undefined"

    # ---- lane-dense (rows, 128) view; copy-free whenever numel % 128 == 0 -------------
    p = preds.reshape(-1)
    t = targets.reshape(-1)
    rem = total % _LANE
    if rem:
        # Rare path: pad the flat arrays (< 128 zeros); zeros contribute 0 to |p - t|.
        pad = _LANE - rem
        p = jnp.pad(p, (0, pad))
        t = jnp.pad(t, (0, pad))
    rows = p.shape[0] // _LANE
    p2 = p.reshape(rows, _LANE)
    t2 = t.reshape(rows, _LANE)

    # ---- tile sizing (dtype-aware, VMEM-budget safe on v5e/v6e/v7x) -------------------
    itemsize = jnp.dtype(preds.dtype).itemsize
    sub = max(8, 32 // max(itemsize, 1))              # 8 rows f32, 16 rows bf16, 32 int8
    if tile_rows is None:
        tile_rows = _TARGET_BLOCK_BYTES // (_LANE * max(itemsize, 1))
        tile_rows = max(sub, (tile_rows // sub) * sub)
    tile_r = min(tile_rows, rows)
    if tile_r != rows and tile_r % 8 != 0:            # partial tiles must be 8-row aligned
        tile_r = min(((tile_r + 7) // 8) * 8, rows)

    num_tiles = pl.cdiv(rows, tile_r)
    n_chunks = max(1, min(num_chunks, num_tiles))
    tiles_per_chunk = pl.cdiv(num_tiles, n_chunks)
    # n_chunks * tiles_per_chunk may exceed num_tiles by (n_chunks - 1); the index map
    # clamps those DMAs onto the last real tile and the row mask zeroes their contribution.

    def in_index(c, t, meta):
        return (jnp.minimum(c * tiles_per_chunk + t, num_tiles - 1), 0)

    def out_index(c, t, meta):
        return (c, 0)

    meta = jnp.array([rows], dtype=jnp.int32)         # valid row count (SMEM scalar prefetch)

    bytes_in = total * (jnp.dtype(preds.dtype).itemsize + jnp.dtype(targets.dtype).itemsize)
    cost = pl.CostEstimate(flops=3 * total, transcendentals=0,
                           bytes_accessed=bytes_in + n_chunks * 8 * _LANE * 4)

    partials = pl.pallas_call(
        _make_l1_kernel(tile_r, tiles_per_chunk),
        out_shape=jax.ShapeDtypeStruct((n_chunks * 8, _LANE), jnp.float32),
        grid_spec=pltpu.PrefetchScalarGridSpec(
            num_scalar_prefetch=1,
            grid=(n_chunks, tiles_per_chunk),
            in_specs=[
                pl.BlockSpec((tile_r, _LANE), in_index),
                pl.BlockSpec((tile_r, _LANE), in_index),
            ],
            out_specs=pl.BlockSpec((8, _LANE), out_index),
        ),
        compiler_params=pltpu.CompilerParams(
            # Chunk axis is independent (megacore-shardable on v7x); tile axis carries the
            # per-chunk accumulator -> reduction axis, marked arbitrary.
            dimension_semantics=("parallel", "arbitrary"),
        ),
        cost_estimate=cost,
    )(meta, p2, t2)

    # Tiny epilogue: cross-chunk / cross-lane reduce and the mean scaling.
    return jnp.sum(partials) * jnp.float32(1.0 / total)


if __name__ == "__main__":
    key = jax.random.PRNGKey(0)
    k_preds, k_tgt = jax.random.split(key)

    # Primary check: shapes implied by the module (batch=2, channels=4, spatial=16x16).
    shape = (2, 4, 16, 16)
    preds = jax.random.normal(k_preds, shape, dtype=jnp.float32)
    targets = jax.random.normal(k_tgt, shape, dtype=jnp.float32)
    loss = l1_loss(preds, targets)
    jax.block_until_ready(loss)
    ref = jnp.mean(jnp.abs(preds - targets))
    assert jnp.allclose(loss, ref, atol=1e-5, rtol=1e-5), (loss, ref)

    # Extra check: multi-tile grid, 2 parallel chunks, ragged last tile, clamped duplicate tile.
    shape2 = (2, 4, 100, 128)                      # rows = 800
    p2 = jax.random.normal(k_preds, shape2, dtype=jnp.float32)
    t2 = jax.random.normal(k_tgt, shape2, dtype=jnp.float32)
    loss2 = l1_loss(p2, t2, tile_rows=96)          # 9 tiles -> 2 chunks of 5 (one clamped dup)
    ref2 = jnp.mean(jnp.abs(p2 - t2))
    assert jnp.allclose(loss2, ref2, atol=1e-5, rtol=1e-5), (loss2, ref2)

    # Extra check: numel not a multiple of 128 (lane-pad path, odd row count reduce).
    shape3 = (3, 5, 7)
    p3 = jax.random.normal(k_preds, shape3, dtype=jnp.float32)
    t3 = jax.random.normal(k_tgt, shape3, dtype=jnp.float32)
    loss3 = l1_loss(p3, t3)
    ref3 = jnp.mean(jnp.abs(p3 - t3))
    assert jnp.allclose(loss3, ref3, atol=1e-5, rtol=1e-5), (loss3, ref3)

    print("KERNEL_OK")
</pallas_src>

<mosaic_0001>
module attributes {stable_mosaic.version = 11 : i64} {
  func.func @kernel(%arg0: i32, %arg1: i32, %arg2: memref<1xi32, #tpu.memory_space<smem>>, %arg3: memref<16x128xf32, #tpu.memory_space<vmem>>, %arg4: memref<16x128xf32, #tpu.memory_space<vmem>>, %arg5: memref<8x128xf32, #tpu.memory_space<vmem>>) attributes {dimension_semantics = [#tpu.dimension_semantics<parallel>, #tpu.dimension_semantics<arbitrary>], iteration_bounds = array<i64: 1, 1>, scalar_prefetch = 1 : i64, scratch_operands = 0 : i64, tpu.core_type = #tpu.core_type<tc>, window_params = [{transform_indices = @transform_0, window_bounds = array<i64: 16, 128>}, {transform_indices = @transform_1, window_bounds = array<i64: 16, 128>}, {transform_indices = @transform_2, window_bounds = array<i64: 8, 128>}]} {
    %c0_i32 = arith.constant 0 : i32
    %0 = arith.cmpi eq, %arg1, %c0_i32 : i32
    %1 = arith.extui %0 : i1 to i32
    %c0_i32_0 = arith.constant 0 : i32
    %2 = arith.cmpi ne, %1, %c0_i32_0 : i32
    scf.if %2 {
      %cst_10 = arith.constant 0.000000e+00 : f32
      %23 = vector.broadcast %cst_10 : f32 to vector<8x128xf32>
      %c0_11 = arith.constant 0 : index
      %c0_12 = arith.constant 0 : index
      %24 = vector.load %arg5[%c0_11, %c0_12] : memref<8x128xf32, #tpu.memory_space<vmem>>, vector<8x128xf32>
      tpu.vector_store %arg5[%c0_11, %c0_12], %23 {strides = array<i32>} : memref<8x128xf32, #tpu.memory_space<vmem>>, vector<8x128xf32>,
    } else {
    }
    %c0 = arith.constant 0 : index
    %3 = memref.load %arg2[%c0] : memref<1xi32, #tpu.memory_space<smem>>
    %c1_i32 = arith.constant 1 : i32
    %4 = arith.muli %arg0, %c1_i32 : i32
    %5 = arith.addi %4, %arg1 : i32
    %c16_i32 = arith.constant 16 : i32
    %6 = arith.muli %5, %c16_i32 : i32
    %7 = tpu.iota {dimensions = array<i32: 0>} : vector<16x128xi32>
    %8 = vector.broadcast %6 : i32 to vector<16x128xi32>
    %9 = arith.addi %7, %8 : vector<16x128xi32>
    %c0_1 = arith.constant 0 : index
    %c0_2 = arith.constant 0 : index
    %10 = vector.load %arg3[%c0_1, %c0_2] : memref<16x128xf32, #tpu.memory_space<vmem>>, vector<16x128xf32>
    %c0_3 = arith.constant 0 : index
    %c0_4 = arith.constant 0 : index
    %11 = vector.load %arg4[%c0_3, %c0_4] : memref<16x128xf32, #tpu.memory_space<vmem>>, vector<16x128xf32>
    %12 = arith.subf %10, %11 : vector<16x128xf32>
    %13 = vector.broadcast %3 : i32 to vector<16x128xi32>
    %14 = arith.cmpi slt, %9, %13 : vector<16x128xi32>
    %15 = math.absf %12 : vector<16x128xf32>
    %cst = arith.constant 0.000000e+00 : f32
    %16 = vector.broadcast %cst : f32 to vector<16x128xf32>
    %17 = arith.select %14, %15, %16 : vector<16x128xi1>, vector<16x128xf32>
    %18 = vector.shape_cast %17 : vector<16x128xf32> to vector<2x8x128xf32>
    %cst_5 = arith.constant dense<0.000000e+00> : vector<8x128xf32>
    %19 = vector.multi_reduction <add>, %18, %cst_5 [0] : vector<2x8x128xf32> to vector<8x128xf32>
    %c0_6 = arith.constant 0 : index
    %c0_7 = arith.constant 0 : index
    %20 = vector.load %arg5[%c0_6, %c0_7] : memref<8x128xf32, #tpu.memory_space<vmem>>, vector<8x128xf32>
    %21 = arith.addf %20, %19 : vector<8x128xf32>
    %c0_8 = arith.constant 0 : index
    %c0_9 = arith.constant 0 : index
    %22 = vector.load %arg5[%c0_8, %c0_9] : memref<8x128xf32, #tpu.memory_space<vmem>>, vector<8x128xf32>
    tpu.vector_store %arg5[%c0_8, %c0_9], %21 {strides = array<i32>} : memref<8x128xf32, #tpu.memory_space<vmem>>, vector<8x128xf32>,
    return
  }
  func.func @transform_0(%arg0: i32, %arg1: i32, %arg2: memref<1xi32, #tpu.memory_space<smem>>) -> (i32, i32) {
    %c1_i32 = arith.constant 1 : i32
    %0 = arith.muli %arg0, %c1_i32 : i32
    %1 = arith.addi %0, %arg1 : i32
    %c0_i32 = arith.constant 0 : i32
    %2 = arith.minsi %1, %c0_i32 : i32
    %c0_i32_0 = arith.constant 0 : i32
    %c0_i32_1 = arith.constant 0 : i32
    return %2, %c0_i32_0 : i32, i32
  }
  func.func @transform_1(%arg0: i32, %arg1: i32, %arg2: memref<1xi32, #tpu.memory_space<smem>>) -> (i32, i32) {
    %c1_i32 = arith.constant 1 : i32
    %0 = arith.muli %arg0, %c1_i32 : i32
    %1 = arith.addi %0, %arg1 : i32
    %c0_i32 = arith.constant 0 : i32
    %2 = arith.minsi %1, %c0_i32 : i32
    %c0_i32_0 = arith.constant 0 : i32
    %c0_i32_1 = arith.constant 0 : i32
    return %2, %c0_i32_0 : i32, i32
  }
  func.func @transform_2(%arg0: i32, %arg1: i32, %arg2: memref<1xi32, #tpu.memory_space<smem>>) -> (i32, i32) {
    %c0_i32 = arith.constant 0 : i32
    %c0_i32_0 = arith.constant 0 : i32
    return %arg0, %c0_i32 : i32, i32
  }
}

</mosaic_0001>

<bundles_post_ra>
// kernel: tpu_custom_call.1
= control target key start
LH: loop header
LB: loop body
LE: loop exit
PB: predicated region body
PF: predicated region fallthrough
CT: control target
= control target key end

     0   :  { %9 = vsyncpa [#allocation5], 0  ;;  %s240_s0 = inlined_call_operand.<no memory space> [shape: s32[1], index: 0, kind: input, shape index: {}]   ;;  %s241_s1 = inlined_call_operand.hbm [shape: f32[16,128], index: 1, kind: input, shape index: {}]   ;;  %s242_s2 = inlined_call_operand.hbm [shape: f32[16,128], index: 2, kind: input, shape index: {}]   ;;  %s243_s3 = inlined_call_operand.hbm [shape: f32[8,128], index: 3, kind: output, shape index: {}]  }
   0x1   :  { %10 = vsyncpa [#allocation8], 0 }
   0x2   :  { %11 = vsyncpa [#allocation6], 0  ;;  %s22_s14 = sshll.u32 %s241_s1, 4  ;;  %s203_s15 = smov [#allocation4]   ;;  %s23_s14 = int_to_ptr.hbm [resolvable:$true] %s22_s14 }
   0x3   :  { %s24_s16 = sshll.u32 %s203_s15, 4  ;;  %s41_s19 = sshll.u32 %s242_s2, 4  ;;  %s25_s16 = int_to_ptr.vmem [resolvable:$true] %s24_s16  ;;  %s42_s19 = int_to_ptr.hbm [resolvable:$true] %s41_s19 }
   0x4   :  { %s204_s20 = smov 128   ;;  %s205_s21 = smov 8  }
   0x5   :  { %30 = dma.hbm_to_vmem [thread:$0]  %s23_s14, 256, %s25_s16, [#allocation5], %s204_s20, %s204_s20, %s205_s21  }
   0x6   :  { %s206_s22 = smov [#allocation7]  }
   0x7   :  { %s43_s23 = sshll.u32 %s206_s22, 4  ;;  %s44_s23 = int_to_ptr.vmem [resolvable:$true] %s43_s23 }
   0x8   :  { %49 = dma.hbm_to_vmem [thread:$0]  %s42_s19, 256, %s44_s23, [#allocation8], %s204_s20, %s204_s20, %s205_s21  }
   0x9   :  { %197 = dma.done.wait [#allocation5], 256  }
   0xa   :  { %198 = vsyncadd [#allocation5], 4294967040 }
   0xb   :  { %199 = dma.done.wait [#allocation8], 256  }
   0xc   :  { %200 = vsyncadd [#allocation8], 4294967040  ;;  %v74_v0 = vlaneseq  ;;  %v86_v3 = vstv %s240_s0  ;;  %v80_v4 = vld [vmem:[#allocation4] sm:$0xff]  ;;  %v81_v5 = vld [vmem:[#allocation4 + $0x8] sm:$0xff]  ;;  %s207_s2 = smov [#allocation9]   ;;  %s104_s28 = sshll.u32 %s243_s3, 4  ;;  %s105_s28 = int_to_ptr.hbm [resolvable:$true] %s104_s28 }
   0xd   :  { %v82_v6 = vld [vmem:[#allocation7] sm:$0xff]  ;;  %v83_v7 = vld [vmem:[#allocation7 + $0x8] sm:$0xff]  ;;  %s102_s25 = sshll.u32 %s207_s2, 4  ;;  %s103_s25 = int_to_ptr.vmem [resolvable:$true] %s102_s25 }
   0xe   :  { %v75_v1 = vshrl.u32 %v74_v0, 7  ;;  %v84_v8 = vsub.f32 %v80_v4, %v82_v6  ;;  %v85_v9 = vsub.f32 %v81_v5, %v83_v7 }
  0x10   :  { %v76_v2 = vadd.s32 8, %v75_v1  ;;  %vm87_vm0 = vcmp.lt.s32.totalorder %v75_v1, %v86_v3  ;;  %v89_v10 = vand.u32 2147483647, %v84_v8  ;;  %v90_v11 = vand.u32 2147483647, %v85_v9 }
  0x12   :  { %vm88_vm1 = vcmp.lt.s32.totalorder %v76_v2, %v86_v3  ;;  %v91_v12 = vsel %vm87_vm0, %v89_v10, 0.0 }
  0x13   :  { %v92_v13 = vsel %vm88_vm1, %v90_v11, 0.0 }
  0x14   :  { %v93_v14 = vadd.f32 %v92_v13, %v91_v12 }
  0x16   :  { %96 = vst [vmem:[#allocation9] sm:$0xff] %v93_v14 }
  0x17   :  { %107 = dma.vmem_to_hbm [thread:$0]  %s103_s25, 128, %s105_s28, [#allocation6]  }
  0x18   :  { %201 = dma.done.wait [#allocation6], 128  }
  0x19   :  { %202 = vsyncadd [#allocation6], 4294967168 }
  0x1a   :  { %112 = vsyncpa [#allocation5], 1 }
  0x1b   :  { %113 = vsyncpa [#allocation8], 1 }
  0x1c   :  { %114 = vsyncpa [#allocation6], 1 }

</bundles_post_ra>
